<compile_context>
chip_gen: v7x
topology: tpu7x:2x2x1
jax: 0.10.0
libtpu: 0.0.40
codegen_flags: <defaults>
</compile_context>

<pallas_src>
import functools
import math

import jax
import jax.numpy as jnp
from jax.experimental import pallas as pl
from jax.experimental.pallas import tpu as pltpu

_NEG_INF = -1.0e9                 # matches torch masked_fill(mask == 0, -1e9)
_MATMUL_DTYPE = jnp.bfloat16      # MXU-native; accumulation stays f32


def _vmem_limit_bytes():
    # Generation-aware scoped-VMEM limit: ~48 MiB on v7x (64 MiB physical VMEM),
    # ~96 MiB on v5e/v6e (128 MiB physical).
    cap = 64 * 1024 * 1024
    try:
        info = pltpu.get_tpu_info()
        cap = getattr(info, "vmem_capacity_bytes", None) or cap
    except Exception:
        pass
    return min(int(cap * 3 // 4), 112 * 1024 * 1024)


_VMEM_LIMIT = _vmem_limit_bytes()


def _pick_tile(n, candidates):
    # Prefer large MXU-friendly tiles; otherwise take the whole (small) dim,
    # which always satisfies the (8, 128) block rule (block == full array dim).
    for t in candidates:
        if n % t == 0:
            return t
    return n


# ---------------------------------------------------------------------------
# Linear:  y = x @ W + b, tiled over rows (tm), output cols (tn) and K (tkk).
# ---------------------------------------------------------------------------
def _linear_kernel(x_ref, w_ref, b_ref, o_ref, acc_ref):
    kk = pl.program_id(2)

    @pl.when(kk == 0)
    def _init():
        acc_ref[...] = jnp.zeros(acc_ref.shape, acc_ref.dtype)

    acc_ref[...] += jnp.dot(x_ref[...], w_ref[...],
                            preferred_element_type=jnp.float32)

    @pl.when(kk == pl.num_programs(2) - 1)
    def _flush():
        o_ref[...] = (acc_ref[...] + b_ref[...]).astype(o_ref.dtype)


def linear(x2d, w, b):
    """x2d: (N, Din), w: (Din, Dout), b: (Dout,) -> (N, Dout) f32.

    Matmul operands are cast to bf16 (f32 accumulate); bias added in f32.
    """
    N, Din = x2d.shape
    Dout = w.shape[1]
    tm = _pick_tile(N, (512, 256, 128))     # large tm also limits W re-streaming
    tn = _pick_tile(Dout, (512, 256, 128))
    tkk = _pick_tile(Din, (512, 256, 128))
    b2d = b.reshape(1, Dout).astype(jnp.float32)

    cost = pl.CostEstimate(
        flops=2 * N * Din * Dout,
        transcendentals=0,
        bytes_accessed=2 * (N * Din + Din * Dout) + 4 * (Dout + N * Dout),
    )
    return pl.pallas_call(
        _linear_kernel,
        out_shape=jax.ShapeDtypeStruct((N, Dout), jnp.float32),
        grid_spec=pltpu.PrefetchScalarGridSpec(
            num_scalar_prefetch=0,
            grid=(N // tm, Dout // tn, Din // tkk),
            in_specs=[
                pl.BlockSpec((tm, tkk), lambda i, j, kk: (i, kk)),   # activations
                pl.BlockSpec((tkk, tn), lambda i, j, kk: (kk, j)),   # weight tile
                pl.BlockSpec((1, tn), lambda i, j, kk: (0, j)),      # bias
            ],
            out_specs=pl.BlockSpec((tm, tn), lambda i, j, kk: (i, j)),
            scratch_shapes=[pltpu.VMEM((tm, tn), jnp.float32)],
        ),
        compiler_params=pltpu.CompilerParams(
            dimension_semantics=("parallel", "parallel", "arbitrary"),
            vmem_limit_bytes=_VMEM_LIMIT,
        ),
        cost_estimate=cost,
    )(x2d.astype(_MATMUL_DTYPE), w.astype(_MATMUL_DTYPE), b2d)


# ---------------------------------------------------------------------------
# Flash-style multi-head attention over (B, S, D) packed-head layout.
#   grid = (B, q-tiles, kv-tiles); online softmax state in VMEM scratch.
# ---------------------------------------------------------------------------
def _flash_attn_kernel(lens_ref, q_ref, k_ref, v_ref, o_ref,
                       m_sc, l_sc, acc_sc, *, h, dk, scale, use_mask):
    b = pl.program_id(0)
    kv = pl.program_id(2)

    @pl.when(kv == 0)
    def _init():
        m_sc[...] = jnp.full(m_sc.shape, -jnp.inf, m_sc.dtype)
        l_sc[...] = jnp.zeros(l_sc.shape, l_sc.dtype)
        acc_sc[...] = jnp.zeros(acc_sc.shape, acc_sc.dtype)

    q = q_ref[0]          # (tq, D) bf16, heads packed along lanes
    k = k_ref[0]          # (tk, D) bf16
    v = v_ref[0]          # (tk, D) bf16
    tq = q.shape[0]
    tk = k.shape[0]

    bias = None
    if use_mask:
        # Key-padding mask rebuilt in-kernel from prefetched lengths (SMEM),
        # as a single additive f32 bias shared by all heads for this block.
        col = jax.lax.broadcasted_iota(jnp.int32, (tq, tk), 1) + kv * tk
        bias = jnp.where(col < lens_ref[b], 0.0, _NEG_INF).astype(jnp.float32)

    # Static loop over heads; each head lives in a dk-wide lane slice.
    for hd in range(h):
        sl = slice(hd * dk, (hd + 1) * dk)
        # QK^T for this head: (tq, dk) x (tk, dk)^T -> (tq, tk), f32 accumulate.
        s = jax.lax.dot_general(
            q[:, sl], k[:, sl], (((1,), (1,)), ((), ())),
            preferred_element_type=jnp.float32) * scale
        if use_mask:
            s = s + bias

        m_prev = m_sc[:, hd:hd + 1]                                   # (tq, 1)
        m_new = jnp.maximum(m_prev, jnp.max(s, axis=-1, keepdims=True))
        alpha = jnp.exp(m_prev - m_new)
        p = jnp.exp(s - m_new)                                        # (tq, tk) f32
        l_sc[:, hd:hd + 1] = (alpha * l_sc[:, hd:hd + 1]
                              + jnp.sum(p, axis=-1, keepdims=True))
        pv = jax.lax.dot_general(
            p.astype(v.dtype), v[:, sl], (((1,), (0,)), ((), ())),
            preferred_element_type=jnp.float32)                       # (tq, dk)
        acc_sc[:, sl] = alpha * acc_sc[:, sl] + pv
        m_sc[:, hd:hd + 1] = m_new

    @pl.when(kv == pl.num_programs(2) - 1)
    def _flush():
        # EUP approximate reciprocal for the softmax denominator.
        inv = pl.reciprocal(l_sc[...], approx=True)                   # (tq, h)
        for hd in range(h):
            sl = slice(hd * dk, (hd + 1) * dk)
            acc_sc[:, sl] = acc_sc[:, sl] * inv[:, hd:hd + 1]
        # Single lane-dense (tq, D) store — unmasked vst to the packed output.
        o_ref[0] = acc_sc[...].astype(o_ref.dtype)


def flash_attention(q, k, v, lens, h, use_mask):
    """q/k/v: (B, S, D) with heads packed on the last dim; lens: (B,) int32."""
    B, S, D = q.shape
    dk = D // h
    scale = 1.0 / math.sqrt(dk)
    tq = _pick_tile(S, (256, 128))
    tk = _pick_tile(S, (256, 128))
    # TODO(synk): sequences not divisible by 128 above 128 would need padding.

    kernel = functools.partial(_flash_attn_kernel, h=h, dk=dk, scale=scale,
                               use_mask=use_mask)
    cost = pl.CostEstimate(
        flops=4 * B * h * S * S * dk,
        transcendentals=B * h * S * S,
        bytes_accessed=2 * 3 * B * S * D + 4 * B * S * D + 4 * B,
    )
    return pl.pallas_call(
        kernel,
        out_shape=jax.ShapeDtypeStruct((B, S, D), jnp.float32),
        grid_spec=pltpu.PrefetchScalarGridSpec(
            num_scalar_prefetch=1,                       # lens -> SMEM
            grid=(B, S // tq, S // tk),
            in_specs=[
                pl.BlockSpec((1, tq, D), lambda b, qi, ki, _lens: (b, qi, 0)),
                pl.BlockSpec((1, tk, D), lambda b, qi, ki, _lens: (b, ki, 0)),
                pl.BlockSpec((1, tk, D), lambda b, qi, ki, _lens: (b, ki, 0)),
            ],
            out_specs=pl.BlockSpec((1, tq, D), lambda b, qi, ki, _lens: (b, qi, 0)),
            scratch_shapes=[
                pltpu.VMEM((tq, h), jnp.float32),   # running max per head
                pltpu.VMEM((tq, h), jnp.float32),   # running denom per head
                pltpu.VMEM((tq, D), jnp.float32),   # un-normalized output
            ],
        ),
        compiler_params=pltpu.CompilerParams(
            dimension_semantics=("parallel", "parallel", "arbitrary"),
            vmem_limit_bytes=_VMEM_LIMIT,
        ),
        cost_estimate=cost,
    )(lens,
      q.astype(_MATMUL_DTYPE), k.astype(_MATMUL_DTYPE), v.astype(_MATMUL_DTYPE))


# ---------------------------------------------------------------------------
# Full MultiHeadedAttention forward.
# ---------------------------------------------------------------------------
def multi_headed_attention(query, key, value, params, h, mask=None):
    """query/key/value: (B, S, d_model) f32.  params: Wq,bq,Wk,bk,Wv,bv,Wo,bo.

    mask: optional (B, S) or (B, 1, S) key-padding mask (nonzero = attend),
    assumed to be a contiguous prefix per batch row (converted to lengths).
    """
    B, S, D = query.shape
    assert D % h == 0

    if (query is key) and (key is value):
        # Fused Q/K/V projection (self-attention): one activation read, one call.
        w_qkv = jnp.concatenate([params["Wq"], params["Wk"], params["Wv"]], axis=1)
        b_qkv = jnp.concatenate([params["bq"], params["bk"], params["bv"]])
        qkv = linear(query.reshape(B * S, D), w_qkv, b_qkv)        # (B*S, 3D)
        q_p, k_p, v_p = qkv[:, :D], qkv[:, D:2 * D], qkv[:, 2 * D:]
    else:
        q_p = linear(query.reshape(B * S, D), params["Wq"], params["bq"])
        k_p = linear(key.reshape(B * S, D), params["Wk"], params["bk"])
        v_p = linear(value.reshape(B * S, D), params["Wv"], params["bv"])

    # Keep heads packed along the last dim: reshape only, no host transposes.
    q_p = q_p.reshape(B, S, D)
    k_p = k_p.reshape(B, S, D)
    v_p = v_p.reshape(B, S, D)

    if mask is not None:
        m = jnp.asarray(mask)
        if m.ndim == 3:                       # (B, 1, S) -> (B, S)
            m = m[:, 0, :]
        # TODO(synk): only contiguous key-padding masks supported by the
        # lens-based in-kernel mask; arbitrary (B, S, S) masks not emitted.
        lens = jnp.sum(m != 0, axis=-1).astype(jnp.int32)
        use_mask = True
    else:
        lens = jnp.full((B,), S, dtype=jnp.int32)
        use_mask = False

    x = flash_attention(q_p, k_p, v_p, lens, h, use_mask)          # (B, S, D) f32
    out = linear(x.reshape(B * S, D), params["Wo"], params["bo"])
    return out.reshape(B, S, D)


# ---------------------------------------------------------------------------
# Pure-JAX reference (mirrors the PyTorch math exactly, in f32).
# ---------------------------------------------------------------------------
def _reference(query, key, value, params, h, mask=None):
    B, S, D = query.shape
    dk = D // h

    def proj(x, W, b):
        return (x @ W + b).reshape(B, S, h, dk).transpose(0, 2, 1, 3)

    q = proj(query, params["Wq"], params["bq"])
    k = proj(key, params["Wk"], params["bk"])
    v = proj(value, params["Wv"], params["bv"])
    scores = jnp.einsum("bhqd,bhkd->bhqk", q, k) / math.sqrt(dk)
    if mask is not None:
        m = jnp.asarray(mask)
        if m.ndim == 2:
            m = m[:, None, :]
        m = jnp.broadcast_to(m, (B, S, S))
        scores = jnp.where(m[:, None] == 0, _NEG_INF, scores)
    p = jax.nn.softmax(scores, axis=-1)
    x = jnp.einsum("bhqk,bhkd->bhqd", p, v).transpose(0, 2, 1, 3).reshape(B, S, D)
    return x @ params["Wo"] + params["bo"]


if __name__ == "__main__":
    B, S, D, H = 2, 8, 32, 4   # batch, seq, d_model, heads  (d_k = 8)
    keys = jax.random.split(jax.random.PRNGKey(0), 12)

    query = jax.random.normal(keys[0], (B, S, D), dtype=jnp.float32)
    key_in = jax.random.normal(keys[1], (B, S, D), dtype=jnp.float32)
    value = jax.random.normal(keys[2], (B, S, D), dtype=jnp.float32)

    wscale = 1.0 / math.sqrt(D)
    params = {
        "Wq": jax.random.normal(keys[3], (D, D), jnp.float32) * wscale,
        "bq": jax.random.normal(keys[4], (D,), jnp.float32) * 0.01,
        "Wk": jax.random.normal(keys[5], (D, D), jnp.float32) * wscale,
        "bk": jax.random.normal(keys[6], (D,), jnp.float32) * 0.01,
        "Wv": jax.random.normal(keys[7], (D, D), jnp.float32) * wscale,
        "bv": jax.random.normal(keys[8], (D,), jnp.float32) * 0.01,
        "Wo": jax.random.normal(keys[9], (D, D), jnp.float32) * wscale,
        "bo": jax.random.normal(keys[10], (D,), jnp.float32) * 0.01,
    }

    # Key-padding mask: batch 0 attends to all 8 positions, batch 1 only to 5.
    lens = jnp.array([8, 5])
    mask = (jnp.arange(S)[None, :] < lens[:, None]).astype(jnp.int32)   # (B, S)

    # Cross-attention style inputs (separate projections) with a padding mask.
    out_masked = jax.block_until_ready(
        multi_headed_attention(query, key_in, value, params, H, mask=mask))
    # Self-attention (query is key is value) -> fused QKV projection path.
    out_self = jax.block_until_ready(
        multi_headed_attention(query, query, query, params, H))

    ref_masked = _reference(query, key_in, value, params, H, mask=mask)
    ref_self = _reference(query, query, query, params, H)

    assert out_masked.shape == (B, S, D)
    assert out_self.shape == (B, S, D)
    # bf16 matmuls + approx reciprocal -> slightly looser tolerance than f32.
    assert jnp.allclose(out_masked, ref_masked, atol=5e-2, rtol=5e-2), "masked mismatch"
    assert jnp.allclose(out_self, ref_self, atol=5e-2, rtol=5e-2), "self-attn mismatch"

    print("KERNEL_OK")
</pallas_src>

<mosaic_0001>
module attributes {stable_mosaic.version = 11 : i64} {
  func.func @_linear_kernel(%arg0: i32, %arg1: i32, %arg2: i32, %arg3: memref<16x32xbf16, #tpu.memory_space<vmem>>, %arg4: memref<32x32xbf16, #tpu.memory_space<vmem>>, %arg5: memref<1x32xf32, #tpu.memory_space<vmem>>, %arg6: memref<16x32xf32, #tpu.memory_space<vmem>>, %arg7: memref<16x32xf32, #tpu.memory_space<vmem>>) attributes {dimension_semantics = [#tpu.dimension_semantics<parallel>, #tpu.dimension_semantics<parallel>, #tpu.dimension_semantics<arbitrary>], iteration_bounds = array<i64: 1, 1, 1>, scalar_prefetch = 0 : i64, scratch_operands = 1 : i64, tpu.core_type = #tpu.core_type<tc>, window_params = [{transform_indices = @transform_0, window_bounds = array<i64: 16, 32>}, {transform_indices = @transform_1, window_bounds = array<i64: 32, 32>}, {transform_indices = @transform_2, window_bounds = array<i64: 1, 32>}, {transform_indices = @transform_3, window_bounds = array<i64: 16, 32>}]} {
    %c0_i32 = arith.constant 0 : i32
    %0 = arith.cmpi eq, %arg2, %c0_i32 : i32
    %1 = arith.extui %0 : i1 to i32
    %c0_i32_0 = arith.constant 0 : i32
    %2 = arith.cmpi ne, %1, %c0_i32_0 : i32
    scf.if %2 {
      %cst_10 = arith.constant 0.000000e+00 : f32
      %12 = vector.broadcast %cst_10 : f32 to vector<16x32xf32>
      %c0_11 = arith.constant 0 : index
      %c0_12 = arith.constant 0 : index
      %13 = vector.load %arg7[%c0_11, %c0_12] : memref<16x32xf32, #tpu.memory_space<vmem>>, vector<16x32xf32>
      tpu.vector_store %arg7[%c0_11, %c0_12], %12 {strides = array<i32>} : memref<16x32xf32, #tpu.memory_space<vmem>>, vector<16x32xf32>,
    } else {
    }
    %c0 = arith.constant 0 : index
    %c0_1 = arith.constant 0 : index
    %3 = vector.load %arg7[%c0, %c0_1] : memref<16x32xf32, #tpu.memory_space<vmem>>, vector<16x32xf32>
    %c0_2 = arith.constant 0 : index
    %c0_3 = arith.constant 0 : index
    %4 = vector.load %arg3[%c0_2, %c0_3] : memref<16x32xbf16, #tpu.memory_space<vmem>>, vector<16x32xbf16>
    %c0_4 = arith.constant 0 : index
    %c0_5 = arith.constant 0 : index
    %5 = vector.load %arg4[%c0_4, %c0_5] : memref<32x32xbf16, #tpu.memory_space<vmem>>, vector<32x32xbf16>
    %cst = arith.constant dense<0.000000e+00> : vector<16x32xf32>
    %6 = tpu.matmul %4, %5, %cst {dimension_numbers = #tpu.dot_dimension_numbers<[1], [0], [0], [1], [0, 0, 1, 1], [], []>} : vector<16x32xbf16>, vector<32x32xbf16>, vector<16x32xf32> -> vector<16x32xf32>
    %7 = arith.addf %3, %6 : vector<16x32xf32>
    %c0_6 = arith.constant 0 : index
    %c0_7 = arith.constant 0 : index
    %8 = vector.load %arg7[%c0_6, %c0_7] : memref<16x32xf32, #tpu.memory_space<vmem>>, vector<16x32xf32>
    tpu.vector_store %arg7[%c0_6, %c0_7], %7 {strides = array<i32>} : memref<16x32xf32, #tpu.memory_space<vmem>>, vector<16x32xf32>,
    %c0_i32_8 = arith.constant 0 : i32
    %9 = arith.cmpi eq, %arg2, %c0_i32_8 : i32
    %10 = arith.extui %9 : i1 to i32
    %c0_i32_9 = arith.constant 0 : i32
    %11 = arith.cmpi ne, %10, %c0_i32_9 : i32
    scf.if %11 {
      %c0_10 = arith.constant 0 : index
      %c0_11 = arith.constant 0 : index
      %12 = vector.load %arg7[%c0_10, %c0_11] : memref<16x32xf32, #tpu.memory_space<vmem>>, vector<16x32xf32>
      %c0_12 = arith.constant 0 : index
      %c0_13 = arith.constant 0 : index
      %13 = vector.load %arg5[%c0_12, %c0_13] : memref<1x32xf32, #tpu.memory_space<vmem>>, vector<1x32xf32>
      %14 = vector.broadcast %13 : vector<1x32xf32> to vector<16x32xf32>
      %15 = arith.addf %12, %14 : vector<16x32xf32>
      %c0_14 = arith.constant 0 : index
      %c0_15 = arith.constant 0 : index
      %16 = vector.load %arg6[%c0_14, %c0_15] : memref<16x32xf32, #tpu.memory_space<vmem>>, vector<16x32xf32>
      tpu.vector_store %arg6[%c0_14, %c0_15], %15 {strides = array<i32>} : memref<16x32xf32, #tpu.memory_space<vmem>>, vector<16x32xf32>,
    } else {
    }
    return
  }
  func.func @transform_0(%arg0: i32, %arg1: i32, %arg2: i32) -> (i32, i32) {
    %c0_i32 = arith.constant 0 : i32
    return %arg0, %arg2 : i32, i32
  }
  func.func @transform_1(%arg0: i32, %arg1: i32, %arg2: i32) -> (i32, i32) {
    %c0_i32 = arith.constant 0 : i32
    return %arg2, %arg1 : i32, i32
  }
  func.func @transform_2(%arg0: i32, %arg1: i32, %arg2: i32) -> (i32, i32) {
    %c0_i32 = arith.constant 0 : i32
    %c0_i32_0 = arith.constant 0 : i32
    return %c0_i32, %arg1 : i32, i32
  }
  func.func @transform_3(%arg0: i32, %arg1: i32, %arg2: i32) -> (i32, i32) {
    %c0_i32 = arith.constant 0 : i32
    return %arg0, %arg1 : i32, i32
  }
}

</mosaic_0001>

<bundles_post_ra>
// kernel: tpu_custom_call.1
= control target key start
LH: loop header
LB: loop body
LE: loop exit
PB: predicated region body
PF: predicated region fallthrough
CT: control target
= control target key end

     0   :  { %8 = vsyncpa [#allocation4], 0  ;;  %s334_s0 = inlined_call_operand.hbm [shape: bf16[16,32], index: 0, kind: input, shape index: {}]   ;;  %s335_s1 = inlined_call_operand.hbm [shape: bf16[32,32], index: 1, kind: input, shape index: {}]   ;;  %s336_s2 = inlined_call_operand.vmem [shape: f32[1,32], index: 2, kind: input, shape index: {}]   ;;  %s337_s3 = inlined_call_operand.hbm [shape: f32[16,32], index: 3, kind: output, shape index: {}]  }
   0x1   :  { %9 = vsyncpa [#allocation7], 0 }
   0x2   :  { %10 = vsyncpa [#allocation5], 0  ;;  %s259_s12 = smov [#allocation3]   ;;  %s187_s16 = scalar_lea.hbm %s334_s0, 128 }
   0x3   :  { %s16_s13 = sshll.u32 %s259_s12, 4  ;;  %p188_p0 = scmp.ne.s32.totalorder %s334_s0, %s187_s16  ;;  %s17_s13 = int_to_ptr.vmem [resolvable:$true] %s16_s13 }
   0x4   :  { %p191_p1 = scmp.lt.u32.totalorder %s187_s16, %s334_s0 }
   0x6   :  { %p193_p2 = pnand %p191_p1, %p188_p0 }
   0x8   :  { %196 = shalt.err (!%p193_p2)
}
   0x9   :  { %s197_s21 = scalar_lea.vmem %s17_s13, 128  ;;  %p202_p4 = scmp.lt.s32.totalorder %s17_s13, %s17_s13 }
   0xa   :  { %p198_p3 = scmp.ne.s32.totalorder %s17_s13, %s197_s21  ;;  %p203_p5 = scmp.lt.s32.totalorder %s197_s21, %s197_s21 }
   0xc   :  { %p204_p6 = por %p203_p5, %p202_p4 }
   0xe   :  { %p205_p7 = pnand %p204_p6, %p198_p3 }
  0x10   :  { %208 = shalt.err (!%p205_p7)
}
  0x11   :  { %s260_s22 = smov 64   ;;  %s261_s23 = smov 4  }
  0x12   :  { %22 = dma.hbm_to_vmem [thread:$0]  %s334_s0, 128, %s17_s13, [#allocation4], %s260_s22, %s260_s22, %s261_s23  }
  0x13   :  { %s262_s26 = smov [#allocation6]   ;;  %s209_s30 = scalar_lea.hbm %s335_s1, 256 }
  0x14   :  { %s28_s27 = sshll.u32 %s262_s26, 4  ;;  %p210_p8 = scmp.ne.s32.totalorder %s335_s1, %s209_s30  ;;  %s29_s27 = int_to_ptr.vmem [resolvable:$true] %s28_s27 }
  0x15   :  { %p213_p9 = scmp.lt.u32.totalorder %s209_s30, %s335_s1 }
  0x17   :  { %p215_p10 = pnand %p213_p9, %p210_p8 }
  0x19   :  { %218 = shalt.err (!%p215_p10)
}
  0x1a   :  { %s219_s8 = scalar_lea.vmem %s29_s27, 256  ;;  %p224_p12 = scmp.lt.s32.totalorder %s29_s27, %s29_s27 }
  0x1b   :  { %p220_p11 = scmp.ne.s32.totalorder %s29_s27, %s219_s8  ;;  %p225_p13 = scmp.lt.s32.totalorder %s219_s8, %s219_s8 }
  0x1d   :  { %p226_p0 = por %p225_p13, %p224_p12 }
  0x1f   :  { %p227_p1 = pnand %p226_p0, %p220_p11 }
  0x21   :  { %230 = shalt.err (!%p227_p1)
}
  0x22   :  { %34 = dma.hbm_to_vmem [thread:$0]  %s335_s1, 256, %s29_s27, [#allocation7], %s260_s22, %s260_s22, %s261_s23  }
  0x23   :  { %253 = dma.done.wait [#allocation4], 128  }
  0x24   :  { %254 = vsyncadd [#allocation4], 4294967168 }
  0x25   :  { %255 = dma.done.wait [#allocation7], 256  }
  0x26   :  { %256 = vsyncadd [#allocation7], 4294967040  ;;  %vm48_vm0 = vcmask 261120   ;;  %v263_v0 = vmov 0.0   ;;  %vm264_vm1 = vmmov 0   ;;  %v184_v1 = vld [vmem:[#allocation6] sm:$0xff]  }
  0x27   :  { %167 = vmatprep.subr.bf16.mxu0 %v263_v0  ;;  %171 = vmatprep.mubr.msk.bf16.mxu0 %vm264_vm1, %v263_v0  ;;  %49 = vst.msk [vmem:[#allocation2] sm:$0xff] %vm48_vm0, %v263_v0  ;;  %50 = vst.msk [vmem:[#allocation2 + $0x8] sm:$0xff] %vm48_vm0, %v263_v0  ;;  %v185_v2 = vld [vmem:[#allocation6 + $0x8] sm:$0xff]   ;;  %v186_v3 = vld [vmem:[#allocation3] sm:$0xff]   ;;  %s265_s11 = smov [#allocation8]  }
  0x28   :  { %168 = vmatpush3.bf16.msra.mxu0 %v184_v1  ;;  %v163_v12 = vld [vmem:[%s336_s2] ss:$0 sm:$0xff]  ;;  %s146_s12 = sshll.u32 %s265_s11, 4  ;;  %s147_s12 = int_to_ptr.vmem [resolvable:$true] %s146_s12 }
  0x29   :  { %169 = vmatprep.subr.bf16.mxu0 %v263_v0  ;;  %s231_s13 = scalar_lea.vmem %s147_s12, 256  ;;  %p236_p3 = scmp.lt.s32.totalorder %s147_s12, %s147_s12 }
  0x2a   :  { %p232_p2 = scmp.ne.s32.totalorder %s147_s12, %s231_s13  ;;  %p237_p4 = scmp.lt.s32.totalorder %s231_s13, %s231_s13 }
  0x2c   :  { %170 = vmatpush3.bf16.msra.mxu0 %v185_v2  ;;  %p238_p5 = por %p237_p4, %p236_p3 }
  0x2e   :  { %v51_v4 = vld [vmem:[#allocation2] sm:$0xff]  ;;  %v52_v6 = vld [vmem:[#allocation2 + $0x8] sm:$0xff]  ;;  %p239_p6 = pnand %p238_p5, %p232_p2 }
  0x2f   :  { %172 = vmatmul.mubr.msk.bf16.vlgmr.msra.gmra.mrb[0].mxu0 %vm48_vm0, %v186_v3 }
 0x102   :  { %v114_v5 = vpop.f32.mrb[0].mxu0 }
 0x103   :  { %v121_v7 = vadd.f32 %v114_v5, %v51_v4  ;;  %v173_v8 = vpop.f32.mrb[1].mxu0 }
 0x104   :  { %v117_v9 = vpop.f32.mrb[2].mxu0 }
 0x105   :  { %123 = vst.msk [vmem:[#allocation2] sm:$0xff] %vm48_vm0, %v121_v7  ;;  %v122_v10 = vadd.f32 %v117_v9, %v52_v6  ;;  %v174_v11 = vpop.f32.mrb[3].mxu0 }
 0x107   :  { %124 = vst.msk [vmem:[#allocation2 + $0x8] sm:$0xff] %vm48_vm0, %v122_v10 }
 0x10c   :  { %v128_v13 = vld [vmem:[#allocation2] sm:$0xff] }
 0x10d   :  { %v137_v14 = vadd.f32 %v163_v12, %v128_v13 }
 0x10e   :  { %v129_v15 = vld [vmem:[#allocation2 + $0x8] sm:$0xff] }
 0x10f   :  { %v138_v16 = vadd.f32 %v163_v12, %v129_v15  ;;  %139 = vst.msk [vmem:[#allocation8] sm:$0xff] %vm48_vm0, %v137_v14 }
 0x111   :  { %140 = vst.msk [vmem:[#allocation8 + $0x8] sm:$0xff] %vm48_vm0, %v138_v16 }
 0x112   :  { %242 = shalt.err (!%p239_p6)
}
 0x113   :  { %s243_s15 = scalar_lea.hbm %s337_s3, 256 }
 0x114   :  { %p244_p7 = scmp.ne.s32.totalorder %s337_s3, %s243_s15  ;;  %p247_p8 = scmp.lt.u32.totalorder %s243_s15, %s337_s3 }
 0x116   :  { %p249_p9 = pnand %p247_p8, %p244_p7 }
 0x118   :  { %252 = shalt.err (!%p249_p9)
}
 0x119   :  { %s266_s20 = smov 128   ;;  %s267_s21 = smov 8  }
 0x11a   :  { %152 = dma.vmem_to_hbm [thread:$0]  %s147_s12, 256, %s337_s3, [#allocation5], %s266_s20, %s266_s20, %s267_s21  }
 0x11b   :  { %257 = dma.done.wait [#allocation5], 256  }
 0x11c   :  { %258 = vsyncadd [#allocation5], 4294967040 }
 0x11d   :  { %156 = vsyncpa [#allocation4], 1 }
 0x11e   :  { %157 = vsyncpa [#allocation7], 1 }
 0x11f   :  { %158 = vsyncpa [#allocation5], 1 }

</bundles_post_ra>
